<compile_context>
chip_gen: v6e
topology: v6e:2x2x1
jax: 0.10.0
libtpu: 0.0.40
codegen_flags: <defaults>
</compile_context>

<pallas_src>
from functools import partial

import jax
import jax.numpy as jnp
from jax.experimental import pallas as pl
from jax.experimental.pallas import tpu as pltpu


def _round_up(x, m):
    return ((x + m - 1) // m) * m


def _vmem_capacity_bytes():
    try:
        info = pltpu.get_tpu_info()
        cap = int(getattr(info, "vmem_capacity_bytes", 0))
        if cap > 0:
            return cap
    except Exception:
        pass
    return 64 * 1024 * 1024  # conservative default (v7x per-core VMEM)


def _choose_node_tile(n_nodes, bytes_per_node, budget_bytes):
    """Largest node tile whose z block fits the budget (multiple of 8 rows,
    unless a single block covers all nodes, which is always legal)."""
    if n_nodes * bytes_per_node <= budget_bytes:
        return n_nodes
    t = budget_bytes // max(bytes_per_node, 1)
    t = max(8, (t // 8) * 8)
    return min(t, n_nodes)


def _score_partial_kernel(z_ref, w1_ref, b1_ref, et_ref, acc_ref, *,
                          rows_per_block, rows_valid, tiles_per_split,
                          inv_n, mask_rows):
    c = pl.program_id(0)          # core-split index ("parallel")
    t = pl.program_id(1)          # node-tile reduction index ("arbitrary")

    @pl.when(t == 0)
    def _init():
        acc_ref[...] = jnp.zeros_like(acc_ref)

    # All heads in one lane-dense MXU matmul (columns stacked head-major),
    # f32 accumulation; z stays in its native dtype.
    h = jnp.tanh(
        jnp.dot(z_ref[...], w1_ref[...], preferred_element_type=jnp.float32)
        + b1_ref[...])                                       # (rows, Kp) f32

    if mask_rows:
        # Zero rows beyond the real node*metapath count: tanh(b1) != 0 would
        # bias the score mean. Also neutralizes phantom grid steps from the
        # core split (their unclamped start is past the end).
        start = (c * tiles_per_split + t) * rows_per_block
        row = jax.lax.broadcasted_iota(jnp.int32, h.shape, 0) + start
        h = jnp.where(row < rows_valid, h, 0.0)

    # Per-metapath node sum as a second MXU matmul (et[m, r] = 1 iff row r of
    # the block belongs to metapath m) -- no reshape / cross-sublane packing.
    acc_ref[...] += jnp.dot(et_ref[...], h,
                            preferred_element_type=jnp.float32) * inv_n


def _weighted_sum_kernel(z_ref, sel_ref, o_ref):
    # out[n, :] = z[n, :, :] weighted by beta, expressed as one lane-dense
    # (tn, M*D) @ (M*D, D) matmul; sel[m*D+d, d] = beta_total[m].
    o_ref[...] = jnp.dot(z_ref[...], sel_ref[...],
                         preferred_element_type=jnp.float32).astype(o_ref.dtype)


def semantic_attention(z, w1, b1, w2, *, node_tile=None, n_split=2):
    """HAN SemanticAttention forward.

    z : (N, M, D)            nodes x metapaths x in_channel
    w1: (num_head, D, H)     first Linear weights (x @ w1 convention)
    b1: (num_head, 1, H)     first Linear bias
    w2: (num_head, H, 1)     second Linear weights (no bias)
    returns (N, D)
    """
    N, M, D = z.shape
    num_head, _, H = w1.shape
    K = num_head * H
    Kp = _round_up(K, 128)        # lane-dense matmul width (pad cols are inert)

    # Stacked-head parameters: column index = h*H + k. Zero padding columns
    # contribute tanh(0)=0 and are sliced off in the epilogue.
    w1_all = jnp.transpose(w1, (1, 0, 2)).reshape(D, K)
    b1_all = b1.reshape(1, K).astype(jnp.float32)
    if Kp != K:
        w1_all = jnp.pad(w1_all, ((0, 0), (0, Kp - K)))
        b1_all = jnp.pad(b1_all, ((0, 0), (0, Kp - K)))
    w1_all = w1_all.astype(z.dtype)            # keep MXU in z's dtype (bf16 ok)

    # Native-layout views of z -- metadata-only reshapes, no HBM copy.
    z_rows = z.reshape(N * M, D)               # pass 1: node-major rows
    z_wide = z.reshape(N, M * D)               # pass 2: lane-dense rows

    # Per-generation tile sizing + explicit VMEM limit.
    vmem_cap = _vmem_capacity_bytes()
    bytes_per_node = M * D * z.dtype.itemsize
    if node_tile is None:
        node_tile = _choose_node_tile(N, bytes_per_node, vmem_cap // 8)
    tn = max(1, min(node_tile, N))
    tnm = tn * M

    n_tiles = pl.cdiv(N * M, tnm)
    n_split = max(1, min(n_split, n_tiles))
    tiles_per_split = pl.cdiv(n_tiles, n_split)
    mask_rows = ((N * M) % tnm != 0) or (n_split * tiles_per_split != n_tiles)

    vmem_limit = int(min(vmem_cap * 3 // 4, 96 * 1024 * 1024))

    # Row -> metapath selector for the in-kernel reduction matmul (tile index
    # independent because rows_per_block is a multiple of M).
    et = (jnp.arange(tnm)[None, :] % M ==
          jnp.arange(M)[:, None]).astype(jnp.float32)          # (M, tnm)

    kernel1 = partial(_score_partial_kernel,
                      rows_per_block=tnm, rows_valid=N * M,
                      tiles_per_split=tiles_per_split,
                      inv_n=1.0 / N, mask_rows=mask_rows)

    def z1_map(c, t):
        # Clamp phantom steps of the core split onto a valid block; the
        # in-kernel row mask (unclamped start) zeroes their contribution.
        return (jnp.minimum(c * tiles_per_split + t, n_tiles - 1), 0)

    # Pass 1: per-(core-split, metapath) sums of tanh(Linear1(z)) over nodes.
    acc_parts = pl.pallas_call(
        kernel1,
        out_shape=jax.ShapeDtypeStruct((n_split, M, Kp), jnp.float32),
        grid_spec=pltpu.PrefetchScalarGridSpec(
            num_scalar_prefetch=0,
            grid=(n_split, tiles_per_split),
            in_specs=[
                pl.BlockSpec((tnm, D), z1_map),                 # z row tile
                pl.BlockSpec((D, Kp), lambda c, t: (0, 0)),     # stacked W1
                pl.BlockSpec((1, Kp), lambda c, t: (0, 0)),     # stacked b1
                pl.BlockSpec((M, tnm), lambda c, t: (0, 0)),    # row->metapath
            ],
            out_specs=pl.BlockSpec((None, M, Kp), lambda c, t: (c, 0, 0)),
        ),
        compiler_params=pltpu.CompilerParams(
            dimension_semantics=("parallel", "arbitrary"),
            vmem_limit_bytes=vmem_limit),
    )(z_rows, w1_all, b1_all, et)

    # Tiny (M, K) epilogue in XLA: Linear2, per-head softmax over metapaths,
    # head average.  Negligible work; enables the cross-core reduction split.
    s = jnp.sum(acc_parts, axis=0)[:, :K] * w2.reshape(1, K).astype(jnp.float32)
    w_heads = s.reshape(M, num_head, H).sum(axis=-1)            # (M, num_head)
    beta = jax.nn.softmax(w_heads, axis=0)                      # softmax over M
    beta_total = jnp.mean(beta, axis=1, keepdims=True)          # (M, 1)

    # Block-diagonal selector embedding beta: sel[m*D+d, d] = beta_total[m].
    sel = jnp.kron(beta_total, jnp.eye(D, dtype=jnp.float32)).astype(z.dtype)

    # Pass 2: weighted metapath sum, fully parallel over node tiles.
    out = pl.pallas_call(
        _weighted_sum_kernel,
        out_shape=jax.ShapeDtypeStruct((N, D), z.dtype),
        grid_spec=pltpu.PrefetchScalarGridSpec(
            num_scalar_prefetch=0,
            grid=(pl.cdiv(N, tn),),
            in_specs=[
                pl.BlockSpec((tn, M * D), lambda t: (t, 0)),    # z node tile
                pl.BlockSpec((M * D, D), lambda t: (0, 0)),     # beta selector
            ],
            out_specs=pl.BlockSpec((tn, D), lambda t: (t, 0)),
        ),
        compiler_params=pltpu.CompilerParams(
            dimension_semantics=("parallel",),
            vmem_limit_bytes=vmem_limit),
    )(z_wide, sel)

    return out


def _reference(z, w1, b1, w2):
    """Pure-JAX replica of the PyTorch forward for verification."""
    num_head = w1.shape[0]
    N = z.shape[0]
    out = jnp.zeros((N, z.shape[2]), jnp.float32)
    for i in range(num_head):
        h1 = jnp.tanh(jnp.einsum('nmd,dh->nmh', z, w1[i]) + b1[i][0])
        s = jnp.einsum('nmh,ho->nmo', h1, w2[i])        # (N, M, 1)
        w = jnp.mean(s, axis=0)                         # (M, 1)
        beta = jax.nn.softmax(w, axis=0)                # (M, 1)
        out = out + jnp.sum(beta[None] * z, axis=1)     # (N, D)
    return out / num_head


if __name__ == "__main__":
    # N deliberately NOT a multiple of the node tile so the cdiv-grid + row
    # masking path (and the phantom core-split step) are exercised.
    N, M = 100, 4            # nodes, metapaths
    in_channel = 32
    hidden_size = 32
    num_head = 2

    key = jax.random.PRNGKey(0)
    kz, k1, k2, k3 = jax.random.split(key, 4)

    z = jax.random.normal(kz, (N, M, in_channel), jnp.float32)

    # PyTorch Linear default init: U(-1/sqrt(fan_in), 1/sqrt(fan_in))
    lim1 = 1.0 / jnp.sqrt(in_channel)
    lim2 = 1.0 / jnp.sqrt(hidden_size)
    w1 = jax.random.uniform(k1, (num_head, in_channel, hidden_size),
                            jnp.float32, -lim1, lim1)
    b1 = jax.random.uniform(k2, (num_head, 1, hidden_size),
                            jnp.float32, -lim1, lim1)
    w2 = jax.random.uniform(k3, (num_head, hidden_size, 1),
                            jnp.float32, -lim2, lim2)

    ref = _reference(z, w1, b1, w2)

    # Small explicit tile -> multi-step reduction grid, partial last block,
    # 2-way core split with one phantom step.
    out = semantic_attention(z, w1, b1, w2, node_tile=16, n_split=2)
    out = jax.block_until_ready(out)
    assert out.shape == (N, in_channel)
    err = jnp.max(jnp.abs(out - ref))
    assert jnp.allclose(out, ref, atol=1e-4, rtol=1e-4), f"max abs err {err}"

    # Default (VMEM-budget-driven) tiling: single block per pass here.
    out2 = semantic_attention(z, w1, b1, w2)
    out2 = jax.block_until_ready(out2)
    err2 = jnp.max(jnp.abs(out2 - ref))
    assert jnp.allclose(out2, ref, atol=1e-4, rtol=1e-4), f"max abs err {err2}"

    print("KERNEL_OK")
</pallas_src>

<mosaic_0001>
module attributes {stable_mosaic.version = 11 : i64} {
  func.func @_score_partial_kernel(%arg0: i32, %arg1: i32, %arg2: memref<64x32xf32, #tpu.memory_space<vmem>>, %arg3: memref<32x128xf32, #tpu.memory_space<vmem>>, %arg4: memref<1x128xf32, #tpu.memory_space<vmem>>, %arg5: memref<4x64xf32, #tpu.memory_space<vmem>>, %arg6: memref<1x4x128xf32, #tpu.memory_space<vmem>>) attributes {dimension_semantics = [#tpu.dimension_semantics<parallel>, #tpu.dimension_semantics<arbitrary>], iteration_bounds = array<i64: 2, 4>, scalar_prefetch = 0 : i64, scratch_operands = 0 : i64, tpu.core_type = #tpu.core_type<tc>, window_params = [{transform_indices = @transform_0, window_bounds = array<i64: 64, 32>}, {pipeline_mode = #tpu.pipeline_mode<synchronous>, transform_indices = @transform_1, window_bounds = array<i64: 32, 128>}, {pipeline_mode = #tpu.pipeline_mode<synchronous>, transform_indices = @transform_2, window_bounds = array<i64: 1, 128>}, {pipeline_mode = #tpu.pipeline_mode<synchronous>, transform_indices = @transform_3, window_bounds = array<i64: 4, 64>}, {transform_indices = @transform_4, window_bounds = array<i64: 1, 4, 128>}]} {
    %c0_i32 = arith.constant 0 : i32
    %0 = arith.cmpi eq, %arg1, %c0_i32 : i32
    %1 = arith.extui %0 : i1 to i32
    %c0_i32_0 = arith.constant 0 : i32
    %2 = arith.cmpi ne, %1, %c0_i32_0 : i32
    scf.if %2 {
      %cst_17 = arith.constant 0.000000e+00 : f32
      %30 = vector.broadcast %cst_17 : f32 to vector<4x128xf32>
      %c0_18 = arith.constant 0 : index
      %c0_19 = arith.constant 0 : index
      %c0_20 = arith.constant 0 : index
      %31 = vector.load %arg6[%c0_18, %c0_19, %c0_20] : memref<1x4x128xf32, #tpu.memory_space<vmem>>, vector<1x4x128xf32>
      %32 = vector.shape_cast %31 : vector<1x4x128xf32> to vector<4x128xf32>
      %33 = vector.shape_cast %30 : vector<4x128xf32> to vector<1x4x128xf32>
      tpu.vector_store %arg6[%c0_18, %c0_19, %c0_20], %33 {strides = array<i32>} : memref<1x4x128xf32, #tpu.memory_space<vmem>>, vector<1x4x128xf32>,
    } else {
    }
    %c0 = arith.constant 0 : index
    %c0_1 = arith.constant 0 : index
    %3 = vector.load %arg2[%c0, %c0_1] : memref<64x32xf32, #tpu.memory_space<vmem>>, vector<64x32xf32>
    %c0_2 = arith.constant 0 : index
    %c0_3 = arith.constant 0 : index
    %4 = vector.load %arg3[%c0_2, %c0_3] : memref<32x128xf32, #tpu.memory_space<vmem>>, vector<32x128xf32>
    %cst = arith.constant dense<0.000000e+00> : vector<64x128xf32>
    %5 = tpu.matmul %3, %4, %cst {dimension_numbers = #tpu.dot_dimension_numbers<[1], [0], [0], [1], [0, 0, 1, 1], [], []>} : vector<64x32xf32>, vector<32x128xf32>, vector<64x128xf32> -> vector<64x128xf32>
    %c0_4 = arith.constant 0 : index
    %c0_5 = arith.constant 0 : index
    %6 = vector.load %arg4[%c0_4, %c0_5] : memref<1x128xf32, #tpu.memory_space<vmem>>, vector<1x128xf32>
    %7 = vector.broadcast %6 : vector<1x128xf32> to vector<64x128xf32>
    %8 = arith.addf %5, %7 : vector<64x128xf32>
    %9 = math.tanh %8 : vector<64x128xf32>
    %c4_i32 = arith.constant 4 : i32
    %10 = arith.muli %arg0, %c4_i32 : i32
    %11 = arith.addi %10, %arg1 : i32
    %c64_i32 = arith.constant 64 : i32
    %12 = arith.muli %11, %c64_i32 : i32
    %13 = tpu.iota {dimensions = array<i32: 0>} : vector<64x128xi32>
    %14 = vector.broadcast %12 : i32 to vector<64x128xi32>
    %15 = arith.addi %13, %14 : vector<64x128xi32>
    %c400_i32 = arith.constant 400 : i32
    %16 = vector.broadcast %c400_i32 : i32 to vector<64x128xi32>
    %17 = arith.cmpi slt, %15, %16 : vector<64x128xi32>
    %cst_6 = arith.constant 0.000000e+00 : f32
    %18 = vector.broadcast %cst_6 : f32 to vector<64x128xf32>
    %19 = arith.select %17, %9, %18 : vector<64x128xi1>, vector<64x128xf32>
    %c0_7 = arith.constant 0 : index
    %c0_8 = arith.constant 0 : index
    %c0_9 = arith.constant 0 : index
    %20 = vector.load %arg6[%c0_7, %c0_8, %c0_9] : memref<1x4x128xf32, #tpu.memory_space<vmem>>, vector<1x4x128xf32>
    %21 = vector.shape_cast %20 : vector<1x4x128xf32> to vector<4x128xf32>
    %c0_10 = arith.constant 0 : index
    %c0_11 = arith.constant 0 : index
    %22 = vector.load %arg5[%c0_10, %c0_11] : memref<4x64xf32, #tpu.memory_space<vmem>>, vector<4x64xf32>
    %cst_12 = arith.constant dense<0.000000e+00> : vector<4x128xf32>
    %23 = tpu.matmul %22, %19, %cst_12 {dimension_numbers = #tpu.dot_dimension_numbers<[1], [0], [0], [1], [0, 0, 1, 1], [], []>} : vector<4x64xf32>, vector<64x128xf32>, vector<4x128xf32> -> vector<4x128xf32>
    %cst_13 = arith.constant 0.00999999977 : f32
    %24 = vector.broadcast %cst_13 : f32 to vector<4x128xf32>
    %25 = arith.mulf %23, %24 : vector<4x128xf32>
    %26 = arith.addf %21, %25 : vector<4x128xf32>
    %c0_14 = arith.constant 0 : index
    %c0_15 = arith.constant 0 : index
    %c0_16 = arith.constant 0 : index
    %27 = vector.load %arg6[%c0_14, %c0_15, %c0_16] : memref<1x4x128xf32, #tpu.memory_space<vmem>>, vector<1x4x128xf32>
    %28 = vector.shape_cast %27 : vector<1x4x128xf32> to vector<4x128xf32>
    %29 = vector.shape_cast %26 : vector<4x128xf32> to vector<1x4x128xf32>
    tpu.vector_store %arg6[%c0_14, %c0_15, %c0_16], %29 {strides = array<i32>} : memref<1x4x128xf32, #tpu.memory_space<vmem>>, vector<1x4x128xf32>,
    return
  }
  func.func @transform_0(%arg0: i32, %arg1: i32) -> (i32, i32) {
    %c4_i32 = arith.constant 4 : i32
    %0 = arith.muli %arg0, %c4_i32 : i32
    %1 = arith.addi %0, %arg1 : i32
    %c6_i32 = arith.constant 6 : i32
    %2 = arith.minsi %1, %c6_i32 : i32
    %c0_i32 = arith.constant 0 : i32
    %c0_i32_0 = arith.constant 0 : i32
    return %2, %c0_i32 : i32, i32
  }
  func.func @transform_1(%arg0: i32, %arg1: i32) -> (i32, i32) {
    %c0_i32 = arith.constant 0 : i32
    %c0_i32_0 = arith.constant 0 : i32
    %c0_i32_1 = arith.constant 0 : i32
    return %c0_i32, %c0_i32_0 : i32, i32
  }
  func.func @transform_2(%arg0: i32, %arg1: i32) -> (i32, i32) {
    %c0_i32 = arith.constant 0 : i32
    %c0_i32_0 = arith.constant 0 : i32
    %c0_i32_1 = arith.constant 0 : i32
    return %c0_i32, %c0_i32_0 : i32, i32
  }
  func.func @transform_3(%arg0: i32, %arg1: i32) -> (i32, i32) {
    %c0_i32 = arith.constant 0 : i32
    %c0_i32_0 = arith.constant 0 : i32
    %c0_i32_1 = arith.constant 0 : i32
    return %c0_i32, %c0_i32_0 : i32, i32
  }
  func.func @transform_4(%arg0: i32, %arg1: i32) -> (i32, i32, i32) {
    %c0_i32 = arith.constant 0 : i32
    %c0_i32_0 = arith.constant 0 : i32
    %c0_i32_1 = arith.constant 0 : i32
    return %arg0, %c0_i32, %c0_i32_0 : i32, i32, i32
  }
}

</mosaic_0001>

<bundles_post_ra>
// kernel: tpu_custom_call.1
= control target key start
LH: loop header
LB: loop body
LE: loop exit
PB: predicated region body
PF: predicated region fallthrough
CT: control target
= control target key end

     0   :  { %9 = vsyncpa [#allocation3], 0  ;;  %s1109_s0 = inlined_call_operand.vmem [shape: f32[400,32], index: 0, kind: input, shape index: {}]   ;;  %s1110_s1 = inlined_call_operand.vmem [shape: f32[32,128], index: 1, kind: input, shape index: {}]   ;;  %s1111_s2 = inlined_call_operand.vmem [shape: f32[1,128], index: 2, kind: input, shape index: {}]   ;;  %s1112_s3 = inlined_call_operand.vmem [shape: f32[4,64], index: 3, kind: input, shape index: {}]   ;;  %s1113_s4 = inlined_call_operand.hbm [shape: f32[2,4,128], index: 4, kind: output, shape index: {}]  }
   0x1   :  { %11 = vsyncpa [#allocation3 + $0x1], 0  ;;  %s929_s15 = smov 0   ;;  %s931_s16 = smov 0  }
   0x2   :  { %s933_s17 = smov 0   ;;  %s935_s18 = smov 0  }
   0x3   :  { %s937_s19 = smov 0   ;;  %s939_s20 = smov 0  }
   0x4   :  { %s941_s21 = smov 0   ;;  %s943_s22 = smov 0  }
   0x5 LB: > { %s620_s23 = sadd.s32 4294967295, %s898_s22   ;;  %s621_s24 = sadd.s32 4294967294, %s898_s22   ;;  %s898_s22 = sphi %s943_s22, %s17_s22   ;;  %s894_s21 = sphi %s941_s21, %s1122_s21   ;;  %s890_s20 = sphi %s939_s20, %s1121_s20   ;;  %s886_s19 = sphi %s937_s19, %s1120_s19   ;;  %s882_s18 = sphi %s935_s18, %s1119_s18   ;;  %s878_s17 = sphi %s933_s17, %s1118_s17   ;;  %s874_s16 = sphi %s931_s16, %s1117_s16   ;;  %s870_s15 = sphi %s929_s15, %s1116_s15  }
   0x6   : > { %s26_s25 = sadd.s32 1, %s890_s20  ;;  %s29_s26 = sadd.s32 1, %s894_s21 }
   0x7   : > { %p27_p0 = scmp.ge.s32.totalorder %s26_s25, 4  ;;  %p143_p1 = scmp.ne.s32.totalorder %s878_s17, %s874_s16 }
   0x8   : > { %p144_p2 = scmp.eq.s32.totalorder %s620_s23, 7  ;;  %p149_p4 = scmp.ne.s32.totalorder %s874_s16, %s870_s15 }
   0x9   : > { %s1124_s25 = smov (%p27_p0, %s26_s25), 0  ;;  %s1126_s26 = smov (!%p27_p0, %s29_s26), %s894_s21 }
   0xa   : > { %p978_p3 = por %p144_p2, %p143_p1  ;;  %p31_p5 = scmp.ge.s32.totalorder %s1126_s26, 2 }
   0xb   : > { %p150_p6 = scmp.eq.s32.totalorder %s621_s24, 7  ;;  %p626_p7 = scmp.ge.s32.totalorder %s898_s22, 1 }
   0xc   : > { %p202_p8 = scmp.lt.s32.totalorder %s898_s22, 9  ;;  %s1128_s26 = smov (%p31_p5, %s1126_s26), 0 }
   0xd   : > { %p988_p9 = por %p150_p6, %p149_p4  ;;  %s130_s29 = ssub.s32 %s894_s21, %s1128_s26 }
   0xe   : > { %p203_p10 = pnand %p626_p7, %p202_p8  ;;  %s133_s30 = sadd.s32 1, %s878_s17 }
   0xf   : > { %p131_p11 = scmp.eq.s32.totalorder %s130_s29, 0  ;;  %s233_s6 = sand.u32 (!%p203_p10), 1, %s874_s16  }
  0x10   : > { %206 = sbr.rel (%p203_p10) target bundleno = 486 (0x1e6), region = 36  ;;  %s628_s7 = sshll.u32 (!%p203_p10), %s886_s19, 2 }
  0x11   : > { %s996_s5 = scalar_select %p131_p11, %s878_s17, %s133_s30  }
  0x12   : > { %s627_s8 = sshll.u32 (!%p203_p10), %s233_s6, 2  ;;  %s1003_s9 = sadd.s32 (!%p203_p10), %s882_s18, %s628_s7 }
  0x13   : > { %p238_p12 = scmp.lt.s32.totalorder (!%p203_p10), %s1003_s9, 6  ;;  %s1012_s24 = scalar_lea.vmem (!%p203_p10), [#allocation2], %s627_s8 }
  0x14   : > { %p631_p0 = scmp.ne.s32.totalorder (!%p203_p10), %s882_s18, 0 }
  0x15   : > { %s239_s10 = scalar_select %p238_p12, %s1003_s9, 6 }
  0x17   : > { %s629_s11 = sshll.u32 %s239_s10, 3 }
  0x18   : > { %p245_p13 = scmp.lt.s32.totalorder %s629_s11, 49  ;;  %261 = sbr.rel (%p631_p0) target bundleno = 31 (0x1f), region = 40 }
  0x1a   : > { %s1130_s11 = smov (!%p245_p13, %s629_s11), 49 }
  0x1b   : > { %s630_s12 = sshll.u32 %s1130_s11, 3 }
  0x1c   : > { %s1010_s23 = scalar_lea.vmem %s1109_s0, %s630_s12 }
  0x1d   : > { %v900_v0 = vmov 0.0  }
  0x1e   : > { %262 = vst [vmem:[%s1012_s24] sm:$0xf] %v900_v0 }
  0x1f PF: > { %v274_v1 = vld [vmem:[%s1110_s1 + $0x18] sm:$0xff]  ;;  %v273_v2 = vld [vmem:[%s1110_s1 + $0x10] sm:$0xff]  ;;  %vm282_vm0 = vcmask 261120   ;;  %v263_v3 = vld [vmem:[%s1010_s23] sm:$0xff]  ;;  %v901_v13 = vmov 0.0   ;;  %vm902_vm1 = vmmov 0   ;;  %v423_v20 = vlaneseq }
  0x20   : > { %677 = vmatprep.subr.mxu0 %v274_v1  ;;  %v272_v4 = vld [vmem:[%s1110_s1 + $0x8] sm:$0xff]  ;;  %685 = vmatprep.mubr.msk.f32.mxu0 %vm282_vm0, %v263_v3  ;;  %v271_v5 = vld [vmem:[%s1110_s1] sm:$0xff]  ;;  %v265_v7 = vld [vmem:[%s1010_s23 + $0x10] sm:$0xff]  ;;  %vm459_vm10 = vcmask 523264   ;;  %s653_s30 = sshll.u32 %s886_s19, 6  ;;  %s550_s7 = sshll.u32 %s1012_s24, 4  ;;  %s551_s7 = int_to_ptr.vmem [resolvable:$true] %s550_s7 }
  0x21   : > { %678 = vmatpush3.msra.mxu0 %v274_v1  ;;  %v264_v6 = vld [vmem:[%s1010_s23 + $0x8] sm:$0xff]  ;;  %v266_v8 = vld [vmem:[%s1010_s23 + $0x18] sm:$0xff]  ;;  %v267_v9 = vld [vmem:[%s1010_s23 + $0x20] sm:$0xff]  ;;  %697 = vmatprep.subr.mxu1 %v901_v13  ;;  %v424_v25 = vshrl.u32 %v423_v20, 7  ;;  %s548_s8 = scalar_lea.hbm %s1113_s4, %s653_s30  ;;  %s537_s11 = scalar_lea.sflag [#allocation3], %s233_s6 }
  0x22   : > { %679 = vmatprep.subr.mxu0 %v273_v2  ;;  %v268_v10 = vld [vmem:[%s1010_s23 + $0x28] sm:$0xff]  ;;  %v269_v11 = vld [vmem:[%s1010_s23 + $0x30] sm:$0xff]  ;;  %v270_v12 = vld [vmem:[%s1010_s23 + $0x38] sm:$0xff]  ;;  %713 = vmatprep.mubr.msk.f32.mxu1 %vm902_vm1, %v901_v13  ;;  %s642_s23 = sshll.u32 %s1003_s9, 6  ;;  %s806_s12 = scalar_lea.vmem %s551_s7, 64 }
  0x23   : > { %680 = vmatpush3.msra.mxu0 %v273_v2  ;;  %v632_v21 = vld [vmem:[%s1111_s2] ss:$0 sm:$0xff]  ;;  %v431_v29 = vadd.s32 56, %v424_v25  ;;  %v432_v31 = vstv %s642_s23  ;;  %v430_v32 = vadd.s32 48, %v424_v25  ;;  %v429_v35 = vadd.s32 40, %v424_v25  ;;  %p807_p1 = scmp.ne.s32.totalorder %s551_s7, %s806_s12  ;;  %s903_s13 = smov [#allocation2]  }
  0x24   : > { %681 = vmatprep.subr.mxu0 %v272_v4  ;;  %v428_v38 = vadd.s32 32, %v424_v25  ;;  %v427_v41 = vadd.s32 24, %v424_v25  ;;  %v426_v44 = vadd.s32 16, %v424_v25  ;;  %v425_v47 = vadd.s32 8, %v424_v25  ;;  %v458_v56 = vld [vmem:[%s1112_s3] sm:$0xf] }
  0x25   : > { %682 = vmatpush3.msra.mxu0 %v272_v4  ;;  %v440_v34 = vadd.s32 %v432_v31, %v431_v29  ;;  %v439_v37 = vadd.s32 %v432_v31, %v430_v32  ;;  %v438_v40 = vadd.s32 %v432_v31, %v429_v35  ;;  %v433_v53 = vadd.s32 %v432_v31, %v424_v25  ;;  %v457_v58 = vld [vmem:[%s1012_s24] sm:$0xf]  ;;  %p808_p2 = pnand %p807_p1, %p978_p3  ;;  %s810_s14 = sshll.u32 %s903_s13, 4  ;;  %s811_s14 = int_to_ptr.vmem [resolvable:$false] %s810_s14 }
  0x26   : > { %683 = vmatprep.subr.mxu0 %v271_v5  ;;  %v437_v43 = vadd.s32 %v432_v31, %v428_v38  ;;  %v436_v46 = vadd.s32 %v432_v31, %v427_v41  ;;  %v435_v49 = vadd.s32 %v432_v31, %v426_v44  ;;  %v434_v51 = vadd.s32 %v432_v31, %v425_v47  ;;  %s812_s19 = scalar_lea.vmem %s811_s14, 128  ;;  %p813_p5 = scmp.lt.s32.totalorder %s551_s7, %s811_s14 }
  0x27   : > { %684 = vmatpush3.msra.mxu0 %v271_v5  ;;  %vm448_vm2 = vcmp.lt.s32.totalorder %v440_v34, 400  ;;  %vm447_vm3 = vcmp.lt.s32.totalorder %v439_v37, 400  ;;  %vm446_vm4 = vcmp.lt.s32.totalorder %v438_v40, 400  ;;  %vm441_vm9 = vcmp.lt.s32.totalorder %v433_v53, 400  ;;  %p809_p4 = pneg %p808_p2  ;;  %p814_p6 = scmp.lt.s32.totalorder %s812_s19, %s806_s12 }
  0x28   : > { %686 = vmatmul.mubr.msk.f32.vlgmr.msra.gmra.mxu0 %vm282_vm0, %v264_v6  ;;  %vm445_vm5 = vcmp.lt.s32.totalorder %v437_v43, 400  ;;  %vm444_vm6 = vcmp.lt.s32.totalorder %v436_v46, 400  ;;  %vm443_vm7 = vcmp.lt.s32.totalorder %v435_v49, 400  ;;  %vm442_vm8 = vcmp.lt.s32.totalorder %v434_v51, 400 }
  0x29   : > { %688 = vmatprep.mubr.msk.f32.mxu0 %vm282_vm0, %v265_v7  ;;  %p815_p7 = por %p814_p6, %p813_p5 }
  0x2b   : > { %p816_p8 = pnand %p815_p7, %p809_p4 }
  0x2c   : > { %689 = vmatmul.mubr.msk.f32.gmra.mxu0 %vm282_vm0, %v266_v8 }
  0x2d   : > { %691 = vmatprep.mubr.msk.f32.mxu0 %vm282_vm0, %v267_v9 }
  0x30   : > { %692 = vmatmul.mubr.msk.f32.gmra.mxu0 %vm282_vm0, %v268_v10 }
  0x31   : > { %694 = vmatprep.mubr.msk.f32.mxu0 %vm282_vm0, %v269_v11 }
  0x34   : > { %695 = vmatmul.mubr.msk.f32.gmra.mxu0 %vm282_vm0, %v270_v12 }
  0xe8   : > { %v687_v14 = vpop.f32.mrf.mxu0 }
  0xe9   : > { %v379_v36 = vadd.f32 %v687_v14, %v632_v21 }
  0xea   : > { %v373_v15 = vpop.f32.mrf.mxu0 }
  0xeb   : > { %v374_v39 = vadd.f32 %v632_v21, %v373_v15 }
  0xec   : > { %v690_v16 = vpop.f32.mrf.mxu0 }
  0xed   : > { %v389_v30 = vadd.f32 %v690_v16, %v632_v21 }
  0xee   : > { %v383_v17 = vpop.f32.mrf.mxu0 }
  0xef   : > { %v384_v33 = vadd.f32 %v632_v21, %v383_v17 }
  0xf0   : > { %v693_v18 = vpop.f32.mrf.mxu0 }
  0xf1   : > { %v399_v26 = vadd.f32 %v693_v18, %v632_v21 }
  0xf2   : > { %v393_v19 = vpop.f32.mrf.mxu0 }
  0xf3   : > { %v394_v28 = vadd.f32 %v632_v21, %v393_v19 }
  0xf4   : > { %v696_v22 = vpop.f32.mrf.mxu0 }
  0xf5   : > { %v409_v23 = vadd.f32 %v696_v22, %v632_v21 }
  0xf6   : > { %v403_v24 = vpop.f32.mrf.mxu0 }
  0xf7   : > { %790 = vtanh.f32 %v409_v23  ;;  %v404_v27 = vadd.f32 %v632_v21, %v403_v24 }
  0xf9   : > { %792 = vtanh.f32 %v404_v27 }
  0xfa   : > { %794 = vtanh.f32 %v399_v26 }
  0xfb   : > { %796 = vtanh.f32 %v394_v28 }
  0xfc   : > { %798 = vtanh.f32 %v389_v30 }
  0xfd   : > { %800 = vtanh.f32 %v384_v33 }
  0xfe   : > { %802 = vtanh.f32 %v379_v36 }
  0xff   : > { %804 = vtanh.f32 %v374_v39 }
 0x104   : > { %v791_v42 = vpop.eup %790 }
 0x105   : > { %698 = vmatpush3.msk.msra.mxu1 %vm448_vm2, %v791_v42 }
 0x106   : > { %v793_v45 = vpop.eup %792  ;;  %699 = vmatprep.subr.mxu1 %v901_v13 }
 0x107   : > { %700 = vmatpush3.msk.msra.mxu1 %vm447_vm3, %v793_v45  ;;  %v795_v48 = vpop.eup %794 }
 0x108   : > { %701 = vmatprep.subr.mxu1 %v901_v13  ;;  %v797_v50 = vpop.eup %796 }
 0x109   : > { %702 = vmatpush3.msk.msra.mxu1 %vm446_vm4, %v795_v48  ;;  %v799_v52 = vpop.eup %798 }
 0x10a   : > { %703 = vmatprep.subr.mxu1 %v901_v13  ;;  %v801_v54 = vpop.eup %800 }
 0x10b   : > { %704 = vmatpush3.msk.msra.mxu1 %vm445_vm5, %v797_v50  ;;  %v803_v55 = vpop.eup %802 }
 0x10c   : > { %705 = vmatprep.subr.mxu1 %v901_v13  ;;  %v805_v57 = vpop.eup %804 }
 0x10d   : > { %706 = vmatpush3.msk.msra.mxu1 %vm444_vm6, %v799_v52 }
 0x10e   : > { %707 = vmatprep.subr.mxu1 %v901_v13 }
 0x10f   : > { %708 = vmatpush3.msk.msra.mxu1 %vm443_vm7, %v801_v54 }
 0x110   : > { %709 = vmatprep.subr.mxu1 %v901_v13 }
 0x111   : > { %710 = vmatpush3.msk.msra.mxu1 %vm442_vm8, %v803_v55 }
 0x112   : > { %711 = vmatprep.subr.mxu1 %v901_v13 }
 0x113   : > { %712 = vmatpush3.msk.msra.mxu1 %vm441_vm9, %v805_v57 }
 0x114   : > { %714 = vmatmul.mubr.msk.f32.vlgmr.msra.gmra.mxu1 %vm459_vm10, %v458_v56 }
 0x1d4   : > { %v529_v59 = vpop.f32.mrf.mxu1 }
 0x1d5   : > { %v533_v60 = vmul.f32 0.01, %v529_v59 }
 0x1d6   : > { %v715_v61 = vpop.f32.mrf.mxu1 }
 0x1d7   : > { %v534_v62 = vadd.f32 %v533_v60, %v457_v58 }
 0x1d9   : > { %535 = vst [vmem:[%s1012_s24] sm:$0xf] %v534_v62 }
 0x1da   : > { %819 = shalt.err (!%p816_p8)
}
 0x1db   : > { %s820_s23 = scalar_lea.hbm %s548_s8, 64  ;;  %s824_s9 = scalar_lea.hbm %s1113_s4, 128 }
 0x1dc   : > { %p821_p10 = scmp.ne.s32.totalorder %s548_s8, %s820_s23  ;;  %p825_p13 = scmp.lt.s32.totalorder %s548_s8, %s1113_s4 }
 0x1dd   : > { %p826_p0 = scmp.lt.s32.totalorder %s824_s9, %s820_s23 }
 0x1de   : > { %p822_p11 = pnand %p821_p10, %p978_p3 }
 0x1df   : > { %p827_p1 = por %p826_p0, %p825_p13 }
 0x1e0   : > { %p823_p12 = pneg %p822_p11 }
 0x1e2   : > { %p828_p2 = pnand %p827_p1, %p823_p12 }
 0x1e4   : > { %831 = shalt.err (!%p828_p2)
}
 0x1e5   : > { %716 = dma.vmem_to_hbm [thread:$0]  (%p978_p3), %s551_s7, 64, %s548_s8, %s537_s11  }
 0x1e6 PF: > { %p722_p4 = scmp.ge.s32.totalorder %s898_s22, 2  ;;  %s562_s10 = sand.u32 1, %s870_s15  }
 0x1e7   : > { %s563_s18 = scalar_lea.sflag [#allocation3], %s562_s10 }
 0x1e8   : > { %p719_p5 = pnand %p722_p4, %p988_p9 }
 0x1ea   : > { %p720_p6 = pneg %p719_p5 }
 0x1ec   : > { %865 = dma.done.wait (%p720_p6), %s563_s18, 64  }
 0x1ed   : > { %867 = vsyncadd (%p720_p6), %s563_s18, 4294967232  ;;  %s17_s22 = sadd.s32 1, %s898_s22   ;;  %s1116_s15 = smov %s874_s16 }
 0x1ee   : > { %p14_p7 = scmp.ge.s32.totalorder %s17_s22, 10   ;;  %s1117_s16 = smov %s878_s17 }
 0x1ef   : > { %s1118_s17 = smov %s996_s5  ;;  %s1119_s18 = smov %s890_s20 }
 0x1f0   : > { %s1120_s19 = smov %s894_s21  ;;  %s1121_s20 = smov %s1124_s25 }
 0x1f1   : > { %s1122_s21 = smov %s1128_s26  ;;  %16 = sbr.rel (!%p14_p7) target bundleno = 5 (0x5), region = 75 }
 0x1f6   :  { %568 = vsyncpa [#allocation3], 1 }
 0x1f7   :  { %570 = vsyncpa [#allocation3 + $0x1], 1 }

</bundles_post_ra>
